<compile_context>
chip_gen: v7x
topology: tpu7x:2x2x1
jax: 0.10.0
libtpu: 0.0.40
codegen_flags: <defaults>
</compile_context>

<pallas_src>
import jax
import jax.numpy as jnp
from jax.experimental import pallas as pl
from jax.experimental.pallas import tpu as pltpu

ALPHA = 1.0
GAMMA = 2.0


def _round_up(x, m):
    return ((x + m - 1) // m) * m


def _vmem_capacity_bytes():
    try:
        return int(pltpu.get_tpu_info().vmem_capacity_bytes)
    except Exception:
        return 64 << 20  # conservative fallback: v7x per-TensorCore VMEM


def _budgets(vmem_capacity):
    """Returns (vmem_limit_bytes, in-kernel working-set budget for tile sizing)."""
    if vmem_capacity >= (100 << 20):   # v5e / v6e: 128 MiB physical VMEM
        return 64 << 20, 40 << 20
    # v7x: 64 MiB per TensorCore (scoped default 32 MiB) -> keep total well under.
    return 48 << 20, 28 << 20


def _choose_tile_n(n, c, itemsize, work_budget):
    # Per-row VMEM working-set accounting (what is actually resident per tile row):
    #   2 * c * itemsize : double-buffered wire-dtype logits block
    #   3 * c * 4        : ~3 concurrently-live (tile_n, C) f32 temps
    #                      (x_f32, exp(x - m), one-hot select)
    #   6 * 512          : (tile_n, 1) per-row temps pad to 128 lanes
    #                      (row-iota, max, lse, ce, pt, fl)
    #   2 * 512          : double-buffered (tile_n, 1) int32 targets block at its
    #                      PADDED layout cost (512 B/row, not 4 B/row)
    bytes_per_row = 2 * c * itemsize + 3 * c * 4 + 8 * 512
    rows = max(8, work_budget // bytes_per_row)
    rows = (rows // 8) * 8
    rows = min(rows, _round_up(n, 8))      # don't over-allocate for tiny N
    return max(8, int(rows))


def _dim_semantics(vmem_capacity):
    # v7x (64 MiB/TC) has 2 TensorCores; only CORE_PARALLEL gives a real core
    # split.  Single-TC v5e/v6e keep the plain "parallel" annotation.
    if vmem_capacity < (100 << 20):
        return (pltpu.CORE_PARALLEL,)
    return ("parallel",)


def _make_focal_kernel(n_total, tile_n, alpha, gamma):
    alpha = float(alpha)
    gamma = float(gamma)

    def kernel(logits_ref, targets_ref, partial_ref):
        i = pl.program_id(0)

        x = logits_ref[...].astype(jnp.float32)        # (tile_n, C) f32 working copy
        t = targets_ref[...]                           # (tile_n, 1) int32
        tn, c = x.shape

        # Row validity for the (possibly ragged) last tile.  Mask BEFORE the
        # reductions so padded/garbage rows can never inject NaN/Inf.
        row = jax.lax.broadcasted_iota(jnp.int32, (tn, 1), 0) + i * tile_n
        valid = row < n_total                          # (tn, 1) bool
        x = jnp.where(valid, x, 0.0)

        # cross_entropy (reduction='none'): ce = logsumexp(x) - x[target]
        m = jnp.max(x, axis=-1, keepdims=True)                               # (tn, 1)
        lse = m + jnp.log(jnp.sum(jnp.exp(x - m), axis=-1, keepdims=True))   # (tn, 1)

        # target-logit gather via vectorized one-hot mask (stays on VPU/XLU).
        col = jax.lax.broadcasted_iota(jnp.int32, (tn, c), 1)
        tgt_logit = jnp.sum(jnp.where(col == t, x, 0.0), axis=-1, keepdims=True)

        # Clamp: ce >= 0 exactly; guards the generic-gamma pow path from
        # rounding-induced (1 - pt) < 0 -> NaN.
        ce = jnp.maximum(lse - tgt_logit, 0.0)                               # (tn, 1)
        pt = jnp.exp(-ce)
        one_m_pt = 1.0 - pt
        if gamma == 2.0:
            mod = one_m_pt * one_m_pt   # VPU multiply; float pow would burn the EUP slot
        elif gamma == 1.0:
            mod = one_m_pt
        elif gamma == 0.0:
            mod = jnp.ones_like(one_m_pt)
        else:
            mod = jnp.maximum(one_m_pt, 0.0) ** gamma
        fl = jnp.where(valid, alpha * mod * ce, 0.0)                         # (tn, 1)

        # Lane-dense per-tile partial sum (unmasked stores; one block per grid
        # step so the N axis can be split across cores).
        partial_ref[...] = jnp.full((1, 8, 128), jnp.sum(fl), dtype=jnp.float32)

    return kernel


def focal_loss(logits, targets, alpha=ALPHA, gamma=GAMMA, reduction="mean",
               tile_n=None):
    """logits: (N, C) float (f32 or bf16), targets: (N,) int -> scalar f32 loss."""
    n, c = logits.shape
    itemsize = jnp.dtype(logits.dtype).itemsize
    targets2d = targets.astype(jnp.int32).reshape(n, 1)

    vmem_cap = _vmem_capacity_bytes()
    vmem_limit, work_budget = _budgets(vmem_cap)

    if tile_n is None:
        tile_n = _choose_tile_n(n, c, itemsize, work_budget)
    tile_n = max(8, _round_up(int(tile_n), 8))
    num_tiles = (n + tile_n - 1) // tile_n

    # TODO(synk): for vocab-scale C (>~16K classes) add a second "arbitrary"
    # grid axis over classes with an online (running max / rescaled sum) logsumexp.
    kernel = _make_focal_kernel(n, tile_n, alpha, gamma)

    # If VMEM forces small tiles on a long grid, deepen the logits pipeline so
    # DMA latency stays hidden (~one extra tile of VMEM).
    logits_block_bytes = tile_n * c * itemsize
    if num_tiles >= 8 and logits_block_bytes < (2 << 20):
        logits_spec = pl.BlockSpec((tile_n, c), lambda i: (i, 0),
                                   pipeline_mode=pl.Buffered(3))
    else:
        logits_spec = pl.BlockSpec((tile_n, c), lambda i: (i, 0))

    cost = pl.CostEstimate(
        flops=6 * n * c,
        transcendentals=n * (c + 2),
        bytes_accessed=n * c * itemsize + n * 4 + num_tiles * 8 * 128 * 4,
    )

    def _call(dim_sem):
        return pl.pallas_call(
            kernel,
            out_shape=jax.ShapeDtypeStruct((num_tiles, 8, 128), jnp.float32),
            grid=(num_tiles,),
            in_specs=[
                logits_spec,
                pl.BlockSpec((tile_n, 1), lambda i: (i, 0)),
            ],
            out_specs=pl.BlockSpec((1, 8, 128), lambda i: (i, 0, 0)),
            compiler_params=pltpu.CompilerParams(
                dimension_semantics=dim_sem,
                vmem_limit_bytes=vmem_limit,
            ),
            cost_estimate=cost,
        )(logits, targets2d)

    dim_sem = _dim_semantics(vmem_cap)
    try:
        partials = _call(dim_sem)
    except Exception:
        if dim_sem == ("parallel",):
            raise
        partials = _call(("parallel",))   # fall back if CORE_PARALLEL is rejected

    total = jnp.sum(partials[:, 0, 0])
    if reduction == "mean":
        return total / jnp.float32(n)
    if reduction == "sum":
        return total
    # TODO(synk): reduction='none' needs the per-row fl vector as the kernel output.
    raise NotImplementedError("reduction must be 'mean' or 'sum'")


def _focal_loss_ref(logits, targets, alpha=ALPHA, gamma=GAMMA, reduction="mean"):
    # Pure-JAX reference of F.cross_entropy + focal weighting.
    logp = jax.nn.log_softmax(logits.astype(jnp.float32), axis=-1)
    ce = -jnp.take_along_axis(logp, targets[:, None].astype(jnp.int32), axis=-1)[:, 0]
    pt = jnp.exp(-ce)
    fl = alpha * (1.0 - pt) ** gamma * ce
    return jnp.mean(fl) if reduction == "mean" else jnp.sum(fl)


if __name__ == "__main__":
    key = jax.random.PRNGKey(0)
    k_logits, k_targets = jax.random.split(key)

    N, C = 50, 32  # small: 50 samples, 32 classes (ragged vs. a 16-row tile)
    logits = jax.random.normal(k_logits, (N, C), dtype=jnp.float32)
    targets = jax.random.randint(k_targets, (N,), 0, C, dtype=jnp.int32)

    ref_mean = jax.block_until_ready(_focal_loss_ref(logits, targets))
    ref_sum = jax.block_until_ready(_focal_loss_ref(logits, targets, reduction="sum"))

    # Multi-tile path with a ragged last tile (grid = 4 tiles of 16 rows).
    loss_tiled = jax.block_until_ready(focal_loss(logits, targets, tile_n=16))
    assert jnp.allclose(loss_tiled, ref_mean, rtol=1e-5, atol=1e-5), (loss_tiled, ref_mean)

    # Default (auto tile-size, single tile) path.
    loss_auto = jax.block_until_ready(focal_loss(logits, targets))
    assert jnp.allclose(loss_auto, ref_mean, rtol=1e-5, atol=1e-5), (loss_auto, ref_mean)

    # Sum reduction and bf16 wire dtype.
    loss_sum = jax.block_until_ready(focal_loss(logits, targets, reduction="sum"))
    assert jnp.allclose(loss_sum, ref_sum, rtol=1e-5, atol=1e-5), (loss_sum, ref_sum)

    loss_bf16 = jax.block_until_ready(
        focal_loss(logits.astype(jnp.bfloat16), targets, tile_n=16))
    assert jnp.allclose(loss_bf16, ref_mean, rtol=2e-2, atol=2e-2), (loss_bf16, ref_mean)

    print("KERNEL_OK")
</pallas_src>

<mosaic_0001>
module attributes {stable_mosaic.version = 11 : i64} {
  func.func @kernel(%arg0: i32, %arg1: memref<16x32xf32, #tpu.memory_space<vmem>>, %arg2: memref<16x1xi32, #tpu.memory_space<vmem>>, %arg3: memref<1x8x128xf32, #tpu.memory_space<vmem>>) attributes {dimension_semantics = [#tpu.dimension_semantics<core_parallel>], iteration_bounds = array<i64: 4>, scalar_prefetch = 0 : i64, scratch_operands = 0 : i64, tpu.core_type = #tpu.core_type<tc>, window_params = [{transform_indices = @transform_0, window_bounds = array<i64: 16, 32>}, {transform_indices = @transform_1, window_bounds = array<i64: 16, 1>}, {transform_indices = @transform_2, window_bounds = array<i64: 1, 8, 128>}]} {
    %c0 = arith.constant 0 : index
    %c0_0 = arith.constant 0 : index
    %0 = vector.load %arg1[%c0, %c0_0] : memref<16x32xf32, #tpu.memory_space<vmem>>, vector<16x32xf32>
    %c0_1 = arith.constant 0 : index
    %c0_2 = arith.constant 0 : index
    %1 = vector.load %arg2[%c0_1, %c0_2] : memref<16x1xi32, #tpu.memory_space<vmem>>, vector<16x1xi32>
    %2 = tpu.iota {dimensions = array<i32: 0>} : vector<16x1xi32>
    %c16_i32 = arith.constant 16 : i32
    %3 = arith.muli %arg0, %c16_i32 : i32
    %4 = vector.broadcast %3 : i32 to vector<16x1xi32>
    %5 = arith.addi %2, %4 : vector<16x1xi32>
    %c50_i32 = arith.constant 50 : i32
    %6 = vector.broadcast %c50_i32 : i32 to vector<16x1xi32>
    %7 = arith.cmpi slt, %5, %6 : vector<16x1xi32>
    %cst = arith.constant 0.000000e+00 : f32
    %8 = vector.shape_cast %7 : vector<16x1xi1> to vector<16x1xi1>
    %9 = vector.broadcast %8 : vector<16x1xi1> to vector<16x32xi1>
    %10 = vector.broadcast %cst : f32 to vector<16x32xf32>
    %11 = arith.select %9, %0, %10 : vector<16x32xi1>, vector<16x32xf32>
    %cst_3 = arith.constant dense<0xFF800000> : vector<16xf32>
    %12 = vector.multi_reduction <maximumf>, %11, %cst_3 [1] : vector<16x32xf32> to vector<16xf32>
    %13 = vector.shape_cast %12 : vector<16xf32> to vector<16x1xf32>
    %14 = vector.broadcast %13 : vector<16x1xf32> to vector<16x32xf32>
    %15 = arith.subf %11, %14 : vector<16x32xf32>
    %16 = math.exp %15 : vector<16x32xf32>
    %cst_4 = arith.constant dense<0.000000e+00> : vector<16xf32>
    %17 = vector.multi_reduction <add>, %16, %cst_4 [1] : vector<16x32xf32> to vector<16xf32>
    %18 = vector.shape_cast %17 : vector<16xf32> to vector<16x1xf32>
    %19 = math.log %18 : vector<16x1xf32>
    %20 = arith.addf %13, %19 : vector<16x1xf32>
    %21 = tpu.iota {dimensions = array<i32: 1>} : vector<16x32xi32>
    %22 = vector.broadcast %1 : vector<16x1xi32> to vector<16x32xi32>
    %23 = arith.cmpi eq, %21, %22 : vector<16x32xi32>
    %cst_5 = arith.constant 0.000000e+00 : f32
    %24 = vector.broadcast %cst_5 : f32 to vector<16x32xf32>
    %25 = arith.select %23, %11, %24 : vector<16x32xi1>, vector<16x32xf32>
    %cst_6 = arith.constant dense<0.000000e+00> : vector<16xf32>
    %26 = vector.multi_reduction <add>, %25, %cst_6 [1] : vector<16x32xf32> to vector<16xf32>
    %27 = vector.shape_cast %26 : vector<16xf32> to vector<16x1xf32>
    %28 = arith.subf %20, %27 : vector<16x1xf32>
    %cst_7 = arith.constant 0.000000e+00 : f32
    %29 = vector.broadcast %cst_7 : f32 to vector<16x1xf32>
    %30 = arith.maximumf %28, %29 : vector<16x1xf32>
    %cst_8 = arith.constant 0.000000e+00 : f32
    %31 = vector.broadcast %cst_8 : f32 to vector<16x1xf32>
    %32 = arith.subf %31, %30 : vector<16x1xf32>
    %33 = math.exp %32 : vector<16x1xf32>
    %cst_9 = arith.constant 1.000000e+00 : f32
    %34 = vector.broadcast %cst_9 : f32 to vector<16x1xf32>
    %35 = arith.subf %34, %33 : vector<16x1xf32>
    %36 = arith.mulf %35, %35 : vector<16x1xf32>
    %cst_10 = arith.constant 1.000000e+00 : f32
    %37 = vector.broadcast %cst_10 : f32 to vector<16x1xf32>
    %38 = arith.mulf %37, %36 : vector<16x1xf32>
    %39 = arith.mulf %38, %30 : vector<16x1xf32>
    %cst_11 = arith.constant 0.000000e+00 : f32
    %40 = vector.broadcast %cst_11 : f32 to vector<16x1xf32>
    %41 = arith.select %7, %39, %40 : vector<16x1xi1>, vector<16x1xf32>
    %42 = vector.shape_cast %41 : vector<16x1xf32> to vector<1x16x1xf32>
    %cst_12 = arith.constant dense<0.000000e+00> : vector<1xf32>
    %43 = vector.multi_reduction <add>, %42, %cst_12 [1, 2] : vector<1x16x1xf32> to vector<1xf32>
    %44 = vector.shape_cast %43 : vector<1xf32> to vector<1x1x1xf32>
    %45 = vector.extract %44[0, 0, 0] : f32 from vector<1x1x1xf32>
    %46 = vector.broadcast %45 : f32 to vector<1x8x128xf32>
    %c0_13 = arith.constant 0 : index
    %c0_14 = arith.constant 0 : index
    %c0_15 = arith.constant 0 : index
    %47 = vector.load %arg3[%c0_13, %c0_14, %c0_15] : memref<1x8x128xf32, #tpu.memory_space<vmem>>, vector<1x8x128xf32>
    tpu.vector_store %arg3[%c0_13, %c0_14, %c0_15], %46 {strides = array<i32>} : memref<1x8x128xf32, #tpu.memory_space<vmem>>, vector<1x8x128xf32>,
    return
  }
  func.func @transform_0(%arg0: i32) -> (i32, i32) {
    %c0_i32 = arith.constant 0 : i32
    %c0_i32_0 = arith.constant 0 : i32
    return %arg0, %c0_i32 : i32, i32
  }
  func.func @transform_1(%arg0: i32) -> (i32, i32) {
    %c0_i32 = arith.constant 0 : i32
    %c0_i32_0 = arith.constant 0 : i32
    return %arg0, %c0_i32 : i32, i32
  }
  func.func @transform_2(%arg0: i32) -> (i32, i32, i32) {
    %c0_i32 = arith.constant 0 : i32
    %c0_i32_0 = arith.constant 0 : i32
    %c0_i32_1 = arith.constant 0 : i32
    return %arg0, %c0_i32, %c0_i32_0 : i32, i32, i32
  }
}

module attributes {stable_mosaic.version = 11 : i64} {
  func.func @kernel(%arg0: i32, %arg1: memref<16x32xf32, #tpu.memory_space<vmem>>, %arg2: memref<16x1xi32, #tpu.memory_space<vmem>>, %arg3: memref<1x8x128xf32, #tpu.memory_space<vmem>>) attributes {dimension_semantics = [#tpu.dimension_semantics<parallel>], iteration_bounds = array<i64: 4>, scalar_prefetch = 0 : i64, scratch_operands = 0 : i64, tpu.core_type = #tpu.core_type<tc>, window_params = [{transform_indices = @transform_0, window_bounds = array<i64: 16, 32>}, {transform_indices = @transform_1, window_bounds = array<i64: 16, 1>}, {transform_indices = @transform_2, window_bounds = array<i64: 1, 8, 128>}]} {
    %c0 = arith.constant 0 : index
    %c0_0 = arith.constant 0 : index
    %0 = vector.load %arg1[%c0, %c0_0] : memref<16x32xf32, #tpu.memory_space<vmem>>, vector<16x32xf32>
    %c0_1 = arith.constant 0 : index
    %c0_2 = arith.constant 0 : index
    %1 = vector.load %arg2[%c0_1, %c0_2] : memref<16x1xi32, #tpu.memory_space<vmem>>, vector<16x1xi32>
    %2 = tpu.iota {dimensions = array<i32: 0>} : vector<16x1xi32>
    %c16_i32 = arith.constant 16 : i32
    %3 = arith.muli %arg0, %c16_i32 : i32
    %4 = vector.broadcast %3 : i32 to vector<16x1xi32>
    %5 = arith.addi %2, %4 : vector<16x1xi32>
    %c50_i32 = arith.constant 50 : i32
    %6 = vector.broadcast %c50_i32 : i32 to vector<16x1xi32>
    %7 = arith.cmpi slt, %5, %6 : vector<16x1xi32>
    %cst = arith.constant 0.000000e+00 : f32
    %8 = vector.shape_cast %7 : vector<16x1xi1> to vector<16x1xi1>
    %9 = vector.broadcast %8 : vector<16x1xi1> to vector<16x32xi1>
    %10 = vector.broadcast %cst : f32 to vector<16x32xf32>
    %11 = arith.select %9, %0, %10 : vector<16x32xi1>, vector<16x32xf32>
    %cst_3 = arith.constant dense<0xFF800000> : vector<16xf32>
    %12 = vector.multi_reduction <maximumf>, %11, %cst_3 [1] : vector<16x32xf32> to vector<16xf32>
    %13 = vector.shape_cast %12 : vector<16xf32> to vector<16x1xf32>
    %14 = vector.broadcast %13 : vector<16x1xf32> to vector<16x32xf32>
    %15 = arith.subf %11, %14 : vector<16x32xf32>
    %16 = math.exp %15 : vector<16x32xf32>
    %cst_4 = arith.constant dense<0.000000e+00> : vector<16xf32>
    %17 = vector.multi_reduction <add>, %16, %cst_4 [1] : vector<16x32xf32> to vector<16xf32>
    %18 = vector.shape_cast %17 : vector<16xf32> to vector<16x1xf32>
    %19 = math.log %18 : vector<16x1xf32>
    %20 = arith.addf %13, %19 : vector<16x1xf32>
    %21 = tpu.iota {dimensions = array<i32: 1>} : vector<16x32xi32>
    %22 = vector.broadcast %1 : vector<16x1xi32> to vector<16x32xi32>
    %23 = arith.cmpi eq, %21, %22 : vector<16x32xi32>
    %cst_5 = arith.constant 0.000000e+00 : f32
    %24 = vector.broadcast %cst_5 : f32 to vector<16x32xf32>
    %25 = arith.select %23, %11, %24 : vector<16x32xi1>, vector<16x32xf32>
    %cst_6 = arith.constant dense<0.000000e+00> : vector<16xf32>
    %26 = vector.multi_reduction <add>, %25, %cst_6 [1] : vector<16x32xf32> to vector<16xf32>
    %27 = vector.shape_cast %26 : vector<16xf32> to vector<16x1xf32>
    %28 = arith.subf %20, %27 : vector<16x1xf32>
    %cst_7 = arith.constant 0.000000e+00 : f32
    %29 = vector.broadcast %cst_7 : f32 to vector<16x1xf32>
    %30 = arith.maximumf %28, %29 : vector<16x1xf32>
    %cst_8 = arith.constant 0.000000e+00 : f32
    %31 = vector.broadcast %cst_8 : f32 to vector<16x1xf32>
    %32 = arith.subf %31, %30 : vector<16x1xf32>
    %33 = math.exp %32 : vector<16x1xf32>
    %cst_9 = arith.constant 1.000000e+00 : f32
    %34 = vector.broadcast %cst_9 : f32 to vector<16x1xf32>
    %35 = arith.subf %34, %33 : vector<16x1xf32>
    %36 = arith.mulf %35, %35 : vector<16x1xf32>
    %cst_10 = arith.constant 1.000000e+00 : f32
    %37 = vector.broadcast %cst_10 : f32 to vector<16x1xf32>
    %38 = arith.mulf %37, %36 : vector<16x1xf32>
    %39 = arith.mulf %38, %30 : vector<16x1xf32>
    %cst_11 = arith.constant 0.000000e+00 : f32
    %40 = vector.broadcast %cst_11 : f32 to vector<16x1xf32>
    %41 = arith.select %7, %39, %40 : vector<16x1xi1>, vector<16x1xf32>
    %42 = vector.shape_cast %41 : vector<16x1xf32> to vector<1x16x1xf32>
    %cst_12 = arith.constant dense<0.000000e+00> : vector<1xf32>
    %43 = vector.multi_reduction <add>, %42, %cst_12 [1, 2] : vector<1x16x1xf32> to vector<1xf32>
    %44 = vector.shape_cast %43 : vector<1xf32> to vector<1x1x1xf32>
    %45 = vector.extract %44[0, 0, 0] : f32 from vector<1x1x1xf32>
    %46 = vector.broadcast %45 : f32 to vector<1x8x128xf32>
    %c0_13 = arith.constant 0 : index
    %c0_14 = arith.constant 0 : index
    %c0_15 = arith.constant 0 : index
    %47 = vector.load %arg3[%c0_13, %c0_14, %c0_15] : memref<1x8x128xf32, #tpu.memory_space<vmem>>, vector<1x8x128xf32>
    tpu.vector_store %arg3[%c0_13, %c0_14, %c0_15], %46 {strides = array<i32>} : memref<1x8x128xf32, #tpu.memory_space<vmem>>, vector<1x8x128xf32>,
    return
  }
  func.func @transform_0(%arg0: i32) -> (i32, i32) {
    %c0_i32 = arith.constant 0 : i32
    %c0_i32_0 = arith.constant 0 : i32
    return %arg0, %c0_i32 : i32, i32
  }
  func.func @transform_1(%arg0: i32) -> (i32, i32) {
    %c0_i32 = arith.constant 0 : i32
    %c0_i32_0 = arith.constant 0 : i32
    return %arg0, %c0_i32 : i32, i32
  }
  func.func @transform_2(%arg0: i32) -> (i32, i32, i32) {
    %c0_i32 = arith.constant 0 : i32
    %c0_i32_0 = arith.constant 0 : i32
    %c0_i32_1 = arith.constant 0 : i32
    return %arg0, %c0_i32, %c0_i32_0 : i32, i32, i32
  }
}

</mosaic_0001>

<bundles_post_ra>
// kernel: tpu_custom_call.1
= control target key start
LH: loop header
LB: loop body
LE: loop exit
PB: predicated region body
PF: predicated region fallthrough
CT: control target
= control target key end

     0   :  { %7 = vsyncpa [#allocation3], 0  ;;  %s660_s0 = inlined_call_operand.vmem [shape: f32[50,32], index: 0, kind: input, shape index: {}]   ;;  %s661_s1 = inlined_call_operand.vmem [shape: s32[50,1], index: 1, kind: input, shape index: {}]   ;;  %s662_s2 = inlined_call_operand.hbm [shape: f32[4,8,128], index: 2, kind: output, shape index: {}]  }
   0x1   :  { %9 = vsyncpa [#allocation3 + $0x1], 0  ;;  %s537_s9 = smov 0   ;;  %s539_s10 = smov 0  }
   0x2   :  { %s541_s11 = smov 0   ;;  %s543_s12 = smov 0  }
   0x3 LB: > { %s558_s13 = sadd.s32 4294967295, %s518_s12   ;;  %s386_s14 = sadd.s32 4294967294, %s518_s12   ;;  %s518_s12 = sphi %s543_s12, %s668_s12   ;;  %s514_s11 = sphi %s541_s11, %s667_s11   ;;  %s510_s10 = sphi %s539_s10, %s666_s10   ;;  %s506_s9 = sphi %s537_s9, %s665_s9  }
   0x4   : > { %s562_s15 = sadd.s32 1, %s518_s12   ;;  %s74_s16 = sadd.s32 1, %s514_s11 }
   0x5   : > { %s71_s17 = ssub.s32 %s518_s12, %s562_s15  ;;  %p84_p0 = scmp.ne.s32.totalorder %s514_s11, %s510_s10 }
   0x6   : > { %p72_p1 = scmp.eq.s32.totalorder %s71_s17, 0  ;;  %p85_p2 = scmp.eq.s32.totalorder %s558_s13, 3 }
   0x7   : > { %p90_p3 = scmp.ne.s32.totalorder %s510_s10, %s506_s9  ;;  %p91_p4 = scmp.eq.s32.totalorder %s386_s14, 3 }
   0x8   : > { %s573_s18 = scalar_select %p72_p1, %s514_s11, %s74_s16  }
   0x9   : > { %p575_p5 = por %p85_p2, %p84_p0  ;;  %p579_p6 = por %p91_p4, %p90_p3 }
   0xa   : > { %p389_p7 = scmp.ge.s32.totalorder %s518_s12, 1  ;;  %p143_p8 = scmp.lt.s32.totalorder %s518_s12, 5 }
   0xc   : > { %p144_p9 = pnand %p389_p7, %p143_p8 }
   0xd   : > { %s391_s21 = sshll.u32 (!%p144_p9), %s558_s13, 1  ;;  %v210_v0 = vlaneseq (!%p144_p9)  ;;  %s395_s22 = sshll.u32 (!%p144_p9), %s558_s13, 4  ;;  %v520_v2 = vmov (!%p144_p9), 0   ;;  %vm225_vm1 = vcmask (!%p144_p9), 261120   ;;  %vm286_vm5 = vcmask (!%p144_p9), 7168  }
   0xe   : > { %147 = sbr.rel (%p144_p9) target bundleno = 594 (0x252), region = 28  ;;  %p183_p10 = scmp.lt.s32.totalorder (!%p144_p9), %s391_s21, 6  ;;  %v214_v1 = vstv (!%p144_p9), %s395_s22  ;;  %442 = vset.pattern.permute.xlu1 (!%p144_p9), %v520_v2  ;;  %443 = vset.pattern.permute.xlu0 (!%p144_p9), %v520_v2 }
   0xf   : > { %v211_v3 = vshrl.u32 (!%p144_p9), %v210_v0, 7  ;;  %v251_v22 = vand.u32 (!%p144_p9), 127, %v210_v0  ;;  %s175_s30 = sand.u32 (!%p144_p9), 1, %s510_s10   ;;  %s397_s6 = sshll.u32 (!%p144_p9), %s558_s13, 7 }
  0x10   : > { %s390_s3 = sshll.u32 (!%p144_p9), %s175_s30, 3  ;;  %s620_s16 = scalar_lea.hbm (!%p144_p9), %s662_s2, %s397_s6 }
  0x11   : > { %v587_v4 = vadd.s32 (!%p144_p9), %v214_v1, %v211_v3  ;;  %v212_v5 = vadd.s32 (!%p144_p9), 8, %v211_v3  ;;  %s177_s4 = scalar_lea.vmem (!%p144_p9), [#allocation2], %s390_s3  ;;  %s302_s17 = scalar_lea.sflag (!%p144_p9), [#allocation3], %s175_s30 }
  0x12   : > { %s315_s5 = sshll.u32 (!%p144_p9), %s177_s4, 4  ;;  %s521_s13 = smov (!%p144_p9), [#allocation2]   ;;  %s615_s5 = int_to_ptr.vmem [resolvable:$true] %s315_s5 }
  0x13   : > { %vm217_vm0 = vcmp.lt.s32.totalorder (!%p144_p9), %v587_v4, 50  ;;  %v593_v6 = vadd.s32 (!%p144_p9), %v214_v1, %v212_v5  ;;  %s460_s22 = sshll.u32 (!%p144_p9), %s521_s13, 4  ;;  %s461_s22 = int_to_ptr.vmem [resolvable:$false] %s460_s22 }
  0x14   : > { %p463_p0 = scmp.lt.s32.totalorder (!%p144_p9), %s615_s5, %s461_s22 }
  0x15   : > { %s670_s21 = smov (!%p183_p10, %s391_s21), 6  ;;  %vm218_vm2 = vcmp.lt.s32.totalorder %v593_v6, 50 }
  0x16   : > { %s392_s23 = sshll.u32 %s670_s21, 3  ;;  %s456_s21 = scalar_lea.vmem %s615_s5, 128 }
  0x17   : > { %s186_s26 = scalar_lea.vmem %s660_s0, %s392_s23  ;;  %s200_s29 = scalar_lea.vmem %s661_s1, %s392_s23 }
  0x18   : > { %v206_v7 = vld [vmem:[%s186_s26] sm:$0xff]  ;;  %v207_v8 = vld [vmem:[%s186_s26 + $0x8] sm:$0xff]  ;;  %p457_p11 = scmp.ne.s32.totalorder %s615_s5, %s456_s21  ;;  %s462_s23 = scalar_lea.vmem %s461_s22, 256 }
  0x19   : > { %v208_v9 = vld [vmem:[%s200_s29] sm:$0xff]  ;;  %v223_v10 = vsel %vm217_vm0, %v206_v7, 0.0  ;;  %v224_v12 = vsel %vm218_vm2, %v207_v8, 0.0  ;;  %v209_v13 = vld [vmem:[%s200_s29 + $0x8] sm:$0xff]  ;;  %p464_p1 = scmp.lt.s32.totalorder %s462_s23, %s456_s21 }
  0x1a   : > { %253 = vperm.xlu1 %442, %v208_v9   ;;  %v226_v11 = vsel %vm225_vm1, %v223_v10, -inf  ;;  %v229_v14 = vsel %vm225_vm1, %v224_v12, -inf  ;;  %p458_p12 = pnand %p457_p11, %p575_p5 }
  0x1b   : > { %227 = vmax.xlane.f32.xlu0 %v226_v11  ;;  %p465_p2 = por %p464_p1, %p463_p0 }
  0x1c   : > { %p459_p13 = pneg %p458_p12 }
  0x1e   : > { %256 = vperm.xlu1 %442, %v209_v13   ;;  %p466_p3 = pnand %p465_p2, %p459_p13 }
  0x1f   : > { %230 = vmax.xlane.f32.xlu0 %v229_v14 }
  0x99   : > { %v254_v21 = vpop.permute.xlu1 %253 }
  0x9a   : > { %vm258_vm3 = vcmp.eq.s32.totalorder %v251_v22, %v254_v21 }
  0x9b   : > { %v260_v25 = vsel %vm258_vm3, %v223_v10, 0.0 }
  0x9c   : > { %v262_v27 = vsel %vm225_vm1, %v260_v25, 0.0 }
  0x9d   : > { %v257_v23 = vpop.permute.xlu1 %256 }
  0x9e   : > { %vm259_vm4 = vcmp.eq.s32.totalorder %v251_v22, %v257_v23 }
  0x9f   : > { %v261_v29 = vsel %vm259_vm4, %v224_v12, 0.0 }
  0xa0   : > { %v265_v31 = vsel %vm225_vm1, %v261_v29, 0.0 }
  0xa8   : > { %v228_v15 = vpop.xlane.xlu0 %227 }
  0xa9   : > { %v232_v16 = vsub.f32 %v223_v10, %v228_v15 }
  0xab   : > { %v234_v17 = vmul.f32 1.442695, %v232_v16 }
  0xac   : > { %v231_v18 = vpop.xlane.xlu0 %230 }
  0xad   : > { %444 = vpow2.f32 %v234_v17  ;;  %v233_v19 = vsub.f32 %v224_v12, %v231_v18 }
  0xaf   : > { %v236_v20 = vmul.f32 1.442695, %v233_v19 }
  0xb1   : > { %446 = vpow2.f32 %v236_v20 }
  0xb7   : > { %v445_v24 = vpop.eup %444 }
  0xb8   : > { %v238_v26 = vsel %vm225_vm1, %v445_v24, 0.0 }
  0xb9   : > { %239 = vadd.xlane.f32.xlu0 %v238_v26 }
  0xbb   : > { %v447_v28 = vpop.eup %446 }
  0xbc   : > { %v241_v30 = vsel %vm225_vm1, %v447_v28, 0.0 }
  0xbd   : > { %242 = vadd.xlane.f32.xlu1 %v241_v30  ;;  %263 = vadd.xlane.f32.xlu0 %v262_v27 }
  0xc1   : > { %266 = vadd.xlane.f32.xlu0 %v265_v31 }
 0x146   : > { %v240_v32 = vpop.xlane.xlu0 %239 }
 0x147   : > { %448 = vlog2.f32 %v240_v32 }
 0x14a   : > { %v243_v33 = vpop.xlane.xlu1 %242  ;;  %v264_v36 = vpop.xlane.xlu0 %263 }
 0x14b   : > { %450 = vlog2.f32 %v243_v33 }
 0x14e   : > { %v267_v43 = vpop.xlane.xlu0 %266 }
 0x151   : > { %v449_v34 = vpop.eup %448 }
 0x152   : > { %v245_v35 = vmul.f32 0.6931472, %v449_v34 }
 0x154   : > { %v248_v37 = vadd.f32 %v245_v35, %v228_v15 }
 0x155   : > { %v451_v38 = vpop.eup %450 }
 0x156   : > { %v247_v39 = vmul.f32 0.6931472, %v451_v38  ;;  %v268_v40 = vsub.f32 %v248_v37, %v264_v36 }
 0x158   : > { %v270_v41 = vmax.f32 %v268_v40, 0.0  ;;  %v249_v42 = vadd.f32 %v247_v39, %v231_v18 }
 0x15a   : > { %v272_v44 = vsub.f32 0.0, %v270_v41  ;;  %v269_v45 = vsub.f32 %v249_v42, %v267_v43 }
 0x15c   : > { %v274_v46 = vmul.f32 1.442695, %v272_v44  ;;  %v271_v47 = vmax.f32 %v269_v45, 0.0 }
 0x15e   : > { %452 = vpow2.f32 %v274_v46  ;;  %v273_v48 = vsub.f32 0.0, %v271_v47 }
 0x160   : > { %v276_v49 = vmul.f32 1.442695, %v273_v48 }
 0x162   : > { %454 = vpow2.f32 %v276_v49 }
 0x168   : > { %v453_v50 = vpop.eup %452 }
 0x169   : > { %v278_v51 = vsub.f32 1.0, %v453_v50 }
 0x16b   : > { %v280_v52 = vmul.f32 %v278_v51, %v278_v51 }
 0x16c   : > { %v455_v53 = vpop.eup %454 }
 0x16d   : > { %v282_v54 = vmul.f32 %v280_v52, %v270_v41  ;;  %v279_v55 = vsub.f32 1.0, %v455_v53 }
 0x16f   : > { %v281_v56 = vmul.f32 %v279_v55, %v279_v55  ;;  %v284_v58 = vsel %vm217_vm0, %v282_v54, 0.0 }
 0x170   : > { %v287_v60 = vsel %vm286_vm5, %v284_v58, 0.0 }
 0x171   : > { %v283_v57 = vmul.f32 %v281_v56, %v271_v47 }
 0x173   : > { %v285_v59 = vsel %vm218_vm2, %v283_v57, 0.0 }
 0x174   : > { %v288_v61 = vsel %vm286_vm5, %v285_v59, 0.0 }
 0x175   : > { %v289_v62 = vadd.f32 %v288_v61, %v287_v60 }
 0x177   : > { %290 = vadd.xlane.f32.xlu0 %v289_v62 }
 0x204   : > { %v291_v63 = vpop.xlane.xlu0 %290 }
 0x205   : > { %v292_v0 = vrot.slane %v291_v63, 4 }
 0x207   : > { %v293_v1 = vadd.f32 %v292_v0, %v291_v63 }
 0x209   : > { %v294_v2 = vrot.slane %v293_v1, 2 }
 0x20b   : > { %v295_v3 = vadd.f32 %v294_v2, %v293_v1 }
 0x20d   : > { %v296_v5 = vrot.slane %v295_v3, 1 }
 0x20f   : > { %v297_v7 = vadd.f32 %v296_v5, %v295_v3 }
 0x211   : > { %400 = vpush %v297_v7 }
 0x242   : > { %s401_s7 = spop %400 }
 0x243   : > { %v299_v4 = vstv %s401_s7 }
 0x244   : > { %300 = vst [vmem:[%s177_s4] sm:$0xff] %v299_v4 }
 0x245   : > { %469 = shalt.err (!%p466_p3)
}
 0x246   : > { %s470_s24 = scalar_lea.hbm %s620_s16, 128  ;;  %s474_s27 = scalar_lea.hbm %s662_s2, 512 }
 0x247   : > { %p471_p4 = scmp.ne.s32.totalorder %s620_s16, %s470_s24  ;;  %p475_p9 = scmp.lt.u32.totalorder %s620_s16, %s662_s2 }
 0x248   : > { %p476_p10 = scmp.lt.u32.totalorder %s474_s27, %s470_s24  ;;  %p478_p12 = scmp.lt.u32.totalorder %s470_s24, %s620_s16 }
 0x249   : > { %p472_p7 = pnand %p471_p4, %p575_p5 }
 0x24a   : > { %p477_p11 = por %p476_p10, %p475_p9 }
 0x24b   : > { %p473_p8 = pneg %p472_p7 }
 0x24c   : > { %p479_p13 = por %p478_p12, %p477_p11 }
 0x24e   : > { %p480_p0 = pnand %p479_p13, %p473_p8 }
 0x250   : > { %483 = shalt.err (!%p480_p0)
}
 0x251   : > { %402 = dma.vmem_to_hbm [thread:$0]  (%p575_p5), %s615_s5, 128, %s620_s16, %s302_s17  }
 0x252 PF: > { %p408_p1 = scmp.ge.s32.totalorder %s518_s12, 2  ;;  %s327_s30 = sand.u32 1, %s506_s9  }
 0x253   : > { %s328_s3 = scalar_lea.sflag [#allocation3], %s327_s30 }
 0x254   : > { %p405_p2 = pnand %p408_p1, %p579_p6 }
 0x256   : > { %501 = dma.done.wait (!%p405_p2), %s328_s3, 128  }
 0x257   : > { %503 = vsyncadd (!%p405_p2), %s328_s3, 4294967168  ;;  %p12_p3 = scmp.ge.s32.totalorder %s562_s15, 6   ;;  %s665_s9 = smov %s510_s10 }
 0x258   : > { %s666_s10 = smov %s514_s11  ;;  %s667_s11 = smov %s573_s18 }
 0x259   : > { %s668_s12 = smov %s562_s15  ;;  %14 = sbr.rel (!%p12_p3) target bundleno = 3 (0x3), region = 66 }
 0x260   :  { %333 = vsyncpa [#allocation3], 1 }
 0x261   :  { %335 = vsyncpa [#allocation3 + $0x1], 1 }

</bundles_post_ra>
